<compile_context>
chip_gen: v7x
topology: tpu7x:2x2x1
jax: 0.10.0
libtpu: 0.0.40
codegen_flags: <defaults>
</compile_context>

<pallas_src>
import functools
import math

import jax
import jax.numpy as jnp
from jax import lax
from jax.experimental import pallas as pl
from jax.experimental.pallas import tpu as pltpu


def _layernorm_kernel(*refs, eps, use_rms_norm, h, has_bias, affine_dtype):
    """Normalizes each row of a (tm, H) tile over the last axis."""
    if has_bias:
        x_ref, w_ref, b_ref, o_ref = refs
    else:
        x_ref, w_ref, o_ref = refs
        b_ref = None

    x = x_ref[...].astype(jnp.float32)            # (tm, H)
    inv_h = 1.0 / float(h)

    if use_rms_norm:
        ms = jnp.sum(x * x, axis=-1, keepdims=True) * inv_h
        y = x * lax.rsqrt(ms + eps)
    else:
        # One-pass statistics: var = E[x^2] - mu^2, clamped at 0 to guard
        # against tiny negative values from cancellation.
        s1 = jnp.sum(x, axis=-1, keepdims=True)
        s2 = jnp.sum(x * x, axis=-1, keepdims=True)
        mu = s1 * inv_h
        var = jnp.maximum(s2 * inv_h - mu * mu, 0.0)
        y = (x - mu) * lax.rsqrt(var + eps)

    # Stats always in f32; the affine runs in bf16 only where the VPU has
    # native bf16 (v6e/v7x) — otherwise stays f32 until the final store.
    y = y.astype(affine_dtype)
    out = y * w_ref[...].astype(affine_dtype)
    if has_bias:
        out = out + b_ref[...].astype(affine_dtype)
    o_ref[...] = out.astype(o_ref.dtype)


def _device_kind() -> str:
    try:
        return jax.devices()[0].device_kind.lower()
    except Exception:
        return ""


def _is_v7x() -> bool:
    return "v7" in _device_kind()


def _is_v5_generation() -> bool:
    return "v5" in _device_kind()


def _vmem_capacity_bytes() -> int:
    """Best-effort per-core VMEM query with a device_kind-based fallback."""
    try:
        info = pltpu.get_tpu_info()
        cap = getattr(info, "vmem_capacity_bytes", None)
        if cap:
            return int(cap)
    except Exception:
        pass
    # Fallback: detect generation from device_kind instead of silently
    # assuming the smallest (v7x) VMEM.
    if _is_v7x():
        return 64 << 20
    return 128 << 20  # v5e / v6e per-TensorCore VMEM


def layer_norm(x, weight, bias=None, *, eps: float = 1e-5,
               use_rms_norm: bool = False, block_rows: int | None = None):
    """Pallas LayerNorm / RMSNorm over the last dim of `x`.

    x:      (..., H)
    weight: (H,)
    bias:   (H,) or None
    """
    orig_shape = x.shape
    H = orig_shape[-1]
    rows = math.prod(orig_shape[:-1]) if len(orig_shape) > 1 else 1

    # Degenerate inputs: nothing to normalize.
    if rows == 0 or H == 0:
        return jnp.zeros(orig_shape, x.dtype)

    x2 = x.reshape(rows, H)
    w2 = weight.reshape(1, H)
    b2 = bias.reshape(1, H) if bias is not None else None

    itemsize = x2.dtype.itemsize
    is_v7x = _is_v7x()

    # --- per-generation tile sizing (mem-bound: a few MiB is the plateau) ----
    target_tile_bytes = (2 << 20) if is_v7x else (4 << 20)
    vmem_cap = (40 << 20) if is_v7x else (96 << 20)

    if block_rows is None:
        tm = max(8, target_tile_bytes // (H * max(itemsize, 4)))
    else:
        tm = max(1, block_rows)
    tm = min(tm, rows)
    if tm < rows:
        tm = max(8, (tm // 8) * 8)   # multiple of 8 sublanes unless full extent

    grid = (pl.cdiv(rows, tm),)      # ragged tail handled by Pallas block padding

    # --- VMEM budget: double-buffered in/out tiles + 3 live f32 temporaries --
    tile_elems = tm * H
    need = (2 * tile_elems * itemsize       # input tile, double-buffered
            + 2 * tile_elems * itemsize     # output tile, double-buffered
            + 3 * tile_elems * 4            # f32 intermediates (x, x*x/y, out)
            + 4 * H * 4)                    # resident weight / bias
    vmem_limit = int(min(max(int(need * 1.5), 24 << 20), vmem_cap))

    affine_dtype = (jnp.bfloat16
                    if (x2.dtype == jnp.bfloat16 and not _is_v5_generation())
                    else jnp.float32)

    kernel = functools.partial(
        _layernorm_kernel,
        eps=float(eps),
        use_rms_norm=use_rms_norm,
        h=H,
        has_bias=b2 is not None,
        affine_dtype=affine_dtype,
    )

    in_specs = [
        pl.BlockSpec((tm, H), lambda i: (i, 0)),   # x tile
        pl.BlockSpec((1, H), lambda i: (0, 0)),    # weight (resident)
    ]
    args = [x2, w2]
    if b2 is not None:
        in_specs.append(pl.BlockSpec((1, H), lambda i: (0, 0)))  # bias (resident)
        args.append(b2)

    # HBM-bound custom call: tell XLA roughly how big it is.
    cost = pl.CostEstimate(
        flops=int(6 * rows * H),
        transcendentals=int(rows),                 # one rsqrt per row
        bytes_accessed=int(2 * rows * H * itemsize + 2 * H * 4),
    )

    # On v7x, actually split the row grid across the 2 TensorCores.
    dim_sem = (pltpu.CORE_PARALLEL,) if is_v7x else ("parallel",)

    out = pl.pallas_call(
        kernel,
        out_shape=jax.ShapeDtypeStruct((rows, H), x.dtype),
        grid=grid,
        in_specs=in_specs,
        out_specs=pl.BlockSpec((tm, H), lambda i: (i, 0)),
        compiler_params=pltpu.CompilerParams(
            dimension_semantics=dim_sem,
            vmem_limit_bytes=vmem_limit,
        ),
        cost_estimate=cost,
    )(*args)

    return out.reshape(orig_shape)


def _reference(x, weight, bias, eps, use_rms_norm):
    xf = x.astype(jnp.float32)
    wf = weight.astype(jnp.float32)
    bf = (bias if bias is not None else jnp.zeros_like(weight)).astype(jnp.float32)
    if use_rms_norm:
        y = xf * lax.rsqrt(jnp.mean(xf * xf, axis=-1, keepdims=True) + eps)
    else:
        mu = jnp.mean(xf, axis=-1, keepdims=True)
        var = jnp.mean((xf - mu) ** 2, axis=-1, keepdims=True)
        y = (xf - mu) * lax.rsqrt(var + eps)
    return (y * wf + bf).astype(x.dtype)


if __name__ == "__main__":
    # Small GPT-like shapes: batch=2, seq=8, hidden=32.
    B, T, H = 2, 8, 32
    key = jax.random.PRNGKey(0)
    x = jax.random.normal(key, (B, T, H), dtype=jnp.float32)

    # Deterministic parameter init, matching nn.Parameter(torch.ones/zeros(n)).
    weight = jnp.ones((H,), jnp.float32)
    bias = jnp.zeros((H,), jnp.float32)

    # LayerNorm variant (use_bias=True, use_rms_norm=False).
    y_ln = layer_norm(x, weight, bias, eps=1e-5, use_rms_norm=False)
    # RMSNorm variant (use_bias=False, use_rms_norm=True) — no bias stream.
    y_rms = layer_norm(x, weight, None, eps=1e-5, use_rms_norm=True)

    # bf16 I/O path (exercises the bf16/f32 affine gating).
    xb = x.astype(jnp.bfloat16)
    y_bf16 = layer_norm(xb, weight.astype(jnp.bfloat16),
                        bias.astype(jnp.bfloat16), eps=1e-5, use_rms_norm=False)

    jax.block_until_ready((y_ln, y_rms, y_bf16))

    ref_ln = _reference(x, weight, bias, 1e-5, False)
    ref_rms = _reference(x, weight, None, 1e-5, True)
    ref_bf16 = _reference(xb, weight.astype(jnp.bfloat16),
                          bias.astype(jnp.bfloat16), 1e-5, False)

    assert jnp.allclose(y_ln, ref_ln, atol=1e-5, rtol=1e-5)
    assert jnp.allclose(y_rms, ref_rms, atol=1e-5, rtol=1e-5)
    assert jnp.allclose(y_bf16.astype(jnp.float32),
                        ref_bf16.astype(jnp.float32), atol=2e-2, rtol=2e-2)

    print("KERNEL_OK")
</pallas_src>

<mosaic_0001>
module attributes {stable_mosaic.version = 11 : i64} {
  func.func @_layernorm_kernel(%arg0: i32, %arg1: memref<16x32xf32, #tpu.memory_space<vmem>>, %arg2: memref<1x32xf32, #tpu.memory_space<vmem>>, %arg3: memref<1x32xf32, #tpu.memory_space<vmem>>, %arg4: memref<16x32xf32, #tpu.memory_space<vmem>>) attributes {dimension_semantics = [#tpu.dimension_semantics<parallel>], iteration_bounds = array<i64: 1>, scalar_prefetch = 0 : i64, scratch_operands = 0 : i64, tpu.core_type = #tpu.core_type<tc>, window_params = [{transform_indices = @transform_0, window_bounds = array<i64: 16, 32>}, {pipeline_mode = #tpu.pipeline_mode<synchronous>, transform_indices = @transform_1, window_bounds = array<i64: 1, 32>}, {pipeline_mode = #tpu.pipeline_mode<synchronous>, transform_indices = @transform_2, window_bounds = array<i64: 1, 32>}, {transform_indices = @transform_3, window_bounds = array<i64: 16, 32>}]} {
    %c0 = arith.constant 0 : index
    %c0_0 = arith.constant 0 : index
    %0 = vector.load %arg1[%c0, %c0_0] : memref<16x32xf32, #tpu.memory_space<vmem>>, vector<16x32xf32>
    %cst = arith.constant dense<0.000000e+00> : vector<16xf32>
    %1 = vector.multi_reduction <add>, %0, %cst [1] : vector<16x32xf32> to vector<16xf32>
    %2 = vector.shape_cast %1 : vector<16xf32> to vector<16x1xf32>
    %3 = arith.mulf %0, %0 : vector<16x32xf32>
    %cst_1 = arith.constant dense<0.000000e+00> : vector<16xf32>
    %4 = vector.multi_reduction <add>, %3, %cst_1 [1] : vector<16x32xf32> to vector<16xf32>
    %5 = vector.shape_cast %4 : vector<16xf32> to vector<16x1xf32>
    %cst_2 = arith.constant 3.125000e-02 : f32
    %6 = vector.broadcast %cst_2 : f32 to vector<16x1xf32>
    %7 = arith.mulf %2, %6 : vector<16x1xf32>
    %cst_3 = arith.constant 3.125000e-02 : f32
    %8 = vector.broadcast %cst_3 : f32 to vector<16x1xf32>
    %9 = arith.mulf %5, %8 : vector<16x1xf32>
    %10 = arith.mulf %7, %7 : vector<16x1xf32>
    %11 = arith.subf %9, %10 : vector<16x1xf32>
    %cst_4 = arith.constant 0.000000e+00 : f32
    %12 = vector.broadcast %cst_4 : f32 to vector<16x1xf32>
    %13 = arith.maximumf %11, %12 : vector<16x1xf32>
    %14 = vector.broadcast %7 : vector<16x1xf32> to vector<16x32xf32>
    %15 = arith.subf %0, %14 : vector<16x32xf32>
    %cst_5 = arith.constant 9.99999974E-6 : f32
    %16 = vector.broadcast %cst_5 : f32 to vector<16x1xf32>
    %17 = arith.addf %13, %16 : vector<16x1xf32>
    %18 = math.rsqrt %17 : vector<16x1xf32>
    %19 = vector.broadcast %18 : vector<16x1xf32> to vector<16x32xf32>
    %20 = arith.mulf %15, %19 : vector<16x32xf32>
    %c0_6 = arith.constant 0 : index
    %c0_7 = arith.constant 0 : index
    %21 = vector.load %arg2[%c0_6, %c0_7] : memref<1x32xf32, #tpu.memory_space<vmem>>, vector<1x32xf32>
    %22 = vector.broadcast %21 : vector<1x32xf32> to vector<16x32xf32>
    %23 = arith.mulf %20, %22 : vector<16x32xf32>
    %c0_8 = arith.constant 0 : index
    %c0_9 = arith.constant 0 : index
    %24 = vector.load %arg3[%c0_8, %c0_9] : memref<1x32xf32, #tpu.memory_space<vmem>>, vector<1x32xf32>
    %25 = vector.broadcast %24 : vector<1x32xf32> to vector<16x32xf32>
    %26 = arith.addf %23, %25 : vector<16x32xf32>
    %c0_10 = arith.constant 0 : index
    %c0_11 = arith.constant 0 : index
    %27 = vector.load %arg4[%c0_10, %c0_11] : memref<16x32xf32, #tpu.memory_space<vmem>>, vector<16x32xf32>
    tpu.vector_store %arg4[%c0_10, %c0_11], %26 {strides = array<i32>} : memref<16x32xf32, #tpu.memory_space<vmem>>, vector<16x32xf32>,
    return
  }
  func.func @transform_0(%arg0: i32) -> (i32, i32) {
    %c0_i32 = arith.constant 0 : i32
    %c0_i32_0 = arith.constant 0 : i32
    return %arg0, %c0_i32 : i32, i32
  }
  func.func @transform_1(%arg0: i32) -> (i32, i32) {
    %c0_i32 = arith.constant 0 : i32
    %c0_i32_0 = arith.constant 0 : i32
    %c0_i32_1 = arith.constant 0 : i32
    return %c0_i32, %c0_i32_0 : i32, i32
  }
  func.func @transform_2(%arg0: i32) -> (i32, i32) {
    %c0_i32 = arith.constant 0 : i32
    %c0_i32_0 = arith.constant 0 : i32
    %c0_i32_1 = arith.constant 0 : i32
    return %c0_i32, %c0_i32_0 : i32, i32
  }
  func.func @transform_3(%arg0: i32) -> (i32, i32) {
    %c0_i32 = arith.constant 0 : i32
    %c0_i32_0 = arith.constant 0 : i32
    return %arg0, %c0_i32 : i32, i32
  }
}

</mosaic_0001>

<bundles_post_ra>
// kernel: tpu_custom_call.1
= control target key start
LH: loop header
LB: loop body
LE: loop exit
PB: predicated region body
PF: predicated region fallthrough
CT: control target
= control target key end

     0   :  { %8 = vsyncpa [#allocation3], 0  ;;  %s225_s0 = inlined_call_operand.hbm [shape: f32[16,32], index: 0, kind: input, shape index: {}]   ;;  %s226_s1 = inlined_call_operand.vmem [shape: f32[1,32], index: 1, kind: input, shape index: {}]   ;;  %s227_s2 = inlined_call_operand.vmem [shape: f32[1,32], index: 2, kind: input, shape index: {}]   ;;  %s228_s3 = inlined_call_operand.hbm [shape: f32[16,32], index: 3, kind: output, shape index: {}]  }
   0x1   :  { %9 = vsyncpa [#allocation4], 0  ;;  %s159_s12 = smov [#allocation2]   ;;  %s111_s16 = scalar_lea.hbm %s225_s0, 256 }
   0x2   :  { %s15_s13 = sshll.u32 %s159_s12, 4  ;;  %p112_p0 = scmp.ne.s32.totalorder %s225_s0, %s111_s16  ;;  %s16_s13 = int_to_ptr.vmem [resolvable:$true] %s15_s13 }
   0x3   :  { %p115_p1 = scmp.lt.u32.totalorder %s111_s16, %s225_s0 }
   0x5   :  { %p117_p2 = pnand %p115_p1, %p112_p0 }
   0x7   :  { %120 = shalt.err (!%p117_p2)
}
   0x8   :  { %s121_s21 = scalar_lea.vmem %s16_s13, 256  ;;  %p126_p4 = scmp.lt.s32.totalorder %s16_s13, %s16_s13 }
   0x9   :  { %p122_p3 = scmp.ne.s32.totalorder %s16_s13, %s121_s21  ;;  %p127_p5 = scmp.lt.s32.totalorder %s121_s21, %s121_s21 }
   0xb   :  { %p128_p6 = por %p127_p5, %p126_p4 }
   0xd   :  { %p129_p7 = pnand %p128_p6, %p122_p3 }
   0xf   :  { %132 = shalt.err (!%p129_p7)
}
  0x10   :  { %s160_s22 = smov 128   ;;  %s161_s23 = smov 8  }
  0x11   :  { %21 = dma.hbm_to_vmem [thread:$0]  %s225_s0, 256, %s16_s13, [#allocation3], %s160_s22, %s160_s22, %s161_s23  }
  0x12   :  { %155 = dma.done.wait [#allocation3], 256  }
  0x13   :  { %156 = vsyncadd [#allocation3], 4294967040  ;;  %vm31_vm0 = vcmask 261120   ;;  %v29_v0 = vld [vmem:[#allocation2] sm:$0xff]  ;;  %v30_v1 = vld [vmem:[#allocation2 + $0x8] sm:$0xff]  ;;  %s162_s29 = smov [#allocation5]  }
  0x14   :  { %v32_v2 = vsel %vm31_vm0, %v29_v0, 0.0  ;;  %v38_v3 = vmul.f32 %v29_v0, %v29_v0  ;;  %v39_v4 = vmul.f32 %v30_v1, %v30_v1  ;;  %v35_v6 = vsel %vm31_vm0, %v30_v1, 0.0  ;;  %v101_v26 = vld [vmem:[%s226_s1] ss:$0 sm:$0xff]  ;;  %s89_s30 = sshll.u32 %s162_s29, 4  ;;  %s90_s30 = int_to_ptr.vmem [resolvable:$true] %s89_s30 }
  0x15   :  { %33 = vadd.xlane.f32.xlu0 %v32_v2  ;;  %v102_v28 = vld [vmem:[%s227_s2] ss:$0 sm:$0xff]  ;;  %s133_s1 = scalar_lea.vmem %s90_s30, 256  ;;  %p138_p9 = scmp.lt.s32.totalorder %s90_s30, %s90_s30 }
  0x16   :  { %v40_v5 = vsel %vm31_vm0, %v38_v3, 0.0  ;;  %v43_v7 = vsel %vm31_vm0, %v39_v4, 0.0  ;;  %p134_p8 = scmp.ne.s32.totalorder %s90_s30, %s133_s1  ;;  %p139_p10 = scmp.lt.s32.totalorder %s133_s1, %s133_s1 }
  0x17   :  { %41 = vadd.xlane.f32.xlu1 %v40_v5 }
  0x18   :  { %p140_p11 = por %p139_p10, %p138_p9 }
  0x19   :  { %36 = vadd.xlane.f32.xlu0 %v35_v6 }
  0x1a   :  { %p141_p12 = pnand %p140_p11, %p134_p8 }
  0x1b   :  { %44 = vadd.xlane.f32.xlu1 %v43_v7 }
  0xa2   :  { %v34_v8 = vpop.xlane.xlu0 %33 }
  0xa3   :  { %v46_v9 = vmul.f32 0.03125, %v34_v8 }
  0xa4   :  { %v42_v10 = vpop.xlane.xlu1 %41 }
  0xa5   :  { %v50_v11 = vmul.f32 %v46_v9, %v46_v9  ;;  %v48_v12 = vmul.f32 0.03125, %v42_v10  ;;  %v56_v24 = vsub.f32 %v29_v0, %v46_v9 }
  0xa6   :  { %v37_v13 = vpop.xlane.xlu0 %36 }
  0xa7   :  { %v52_v14 = vsub.f32 %v48_v12, %v50_v11  ;;  %v47_v15 = vmul.f32 0.03125, %v37_v13 }
  0xa8   :  { %v45_v16 = vpop.xlane.xlu1 %44 }
  0xa9   :  { %v54_v17 = vmax.f32 %v52_v14, 0.0  ;;  %v51_v18 = vmul.f32 %v47_v15, %v47_v15  ;;  %v49_v19 = vmul.f32 0.03125, %v45_v16  ;;  %v57_v29 = vsub.f32 %v30_v1, %v47_v15 }
  0xab   :  { %v58_v20 = vadd.f32 1e-05, %v54_v17  ;;  %v53_v21 = vsub.f32 %v49_v19, %v51_v18 }
  0xad   :  { %107 = vrsqrt.f32 %v58_v20  ;;  %v55_v22 = vmax.f32 %v53_v21, 0.0 }
  0xaf   :  { %v59_v23 = vadd.f32 1e-05, %v55_v22 }
  0xb1   :  { %109 = vrsqrt.f32 %v59_v23 }
  0xb7   :  { %v108_v25 = vpop.eup %107 }
  0xb8   :  { %v62_v27 = vmul.f32 %v108_v25, %v56_v24 }
  0xba   :  { %v71_v30 = vmul.f32 %v101_v26, %v62_v27 }
  0xbb   :  { %v110_v31 = vpop.eup %109 }
  0xbc   :  { %v63_v32 = vmul.f32 %v110_v31, %v57_v29  ;;  %v80_v33 = vadd.f32 %v102_v28, %v71_v30 }
  0xbe   :  { %v72_v34 = vmul.f32 %v101_v26, %v63_v32  ;;  %82 = vst.msk [vmem:[#allocation5] sm:$0xff] %vm31_vm0, %v80_v33 }
  0xc0   :  { %v81_v35 = vadd.f32 %v102_v28, %v72_v34 }
  0xc2   :  { %83 = vst.msk [vmem:[#allocation5 + $0x8] sm:$0xff] %vm31_vm0, %v81_v35 }
  0xc3   :  { %144 = shalt.err (!%p141_p12)
}
  0xc4   :  { %s145_s5 = scalar_lea.hbm %s228_s3, 256 }
  0xc5   :  { %p146_p13 = scmp.ne.s32.totalorder %s228_s3, %s145_s5  ;;  %p149_p0 = scmp.lt.u32.totalorder %s145_s5, %s228_s3 }
  0xc7   :  { %p151_p1 = pnand %p149_p0, %p146_p13 }
  0xc9   :  { %154 = shalt.err (!%p151_p1)
}
  0xca   :  { %95 = dma.vmem_to_hbm [thread:$0]  %s90_s30, 256, %s228_s3, [#allocation4], %s160_s22, %s160_s22, %s161_s23  }
  0xcb   :  { %157 = dma.done.wait [#allocation4], 256  }
  0xcc   :  { %158 = vsyncadd [#allocation4], 4294967040 }
  0xcd   :  { %99 = vsyncpa [#allocation3], 1 }
  0xce   :  { %100 = vsyncpa [#allocation4], 1 }

</bundles_post_ra>
